<compile_context>
chip_gen: v7x
topology: tpu7x:2x2x1
jax: 0.10.0
libtpu: 0.0.40
codegen_flags: <defaults>
</compile_context>

<pallas_src>
import jax
import jax.numpy as jnp
from jax.experimental import pallas as pl
from jax.experimental.pallas import tpu as pltpu


def dattn_kernel(x_ref, wlocT_ref, wglob_ref, wfc_ref, bfc_ref,
                 bloc_ref, bglob_ref, out_ref):
    x = x_ref[...].astype(jnp.float32)                  # (TB, L, D)
    TB, L, D = x.shape
    win = wlocT_ref.shape[1]
    pad = (win - 1) // 2

    # ---- local-attention conv scores on the MXU --------------------------
    # S[b, l, dw] = sum_d x[b, l, d] * wloc[dw, d]
    x2 = x.reshape(TB * L, D)
    S = jnp.dot(x2, wlocT_ref[...].astype(jnp.float32),
                preferred_element_type=jnp.float32).reshape(TB, L, win)

    # scores[b, l] = bloc + sum_dw S[b, l + dw - pad, dw]   (zero outside [0, L))
    scores = jnp.zeros((TB, L), jnp.float32) + bloc_ref[0]
    for dw in range(win):                                # win is tiny & static
        off = dw - pad
        col = S[:, :, dw]                                # (TB, L)
        if off == 0:
            sh = col
        elif off > 0:
            sh = jnp.concatenate(
                [col[:, off:], jnp.zeros((TB, off), jnp.float32)], axis=1)
        else:
            sh = jnp.concatenate(
                [jnp.zeros((TB, -off), jnp.float32), col[:, :L + off]], axis=1)
        scores = scores + sh

    # ---- softmax over L (lane axis) — torch Softmax(dim=2) ---------------
    m = jnp.max(scores, axis=-1, keepdims=True)
    e = jnp.exp(scores - m)
    p = e / jnp.sum(e, axis=-1, keepdims=True)           # (TB, L)

    # ---- local / global weighted sums over L (batched MXU matmuls) -------
    local_fea = jnp.einsum('bkl,bld->bkd', p[:, None, :], x,
                           preferred_element_type=jnp.float32)[:, 0, :]   # (TB, D)
    wg = jnp.broadcast_to(wglob_ref[...].astype(jnp.float32)[None], (TB, 1, L))
    global_fea = (jnp.einsum('bkl,bld->bkd', wg, x,
                             preferred_element_type=jnp.float32)[:, 0, :]
                  + bglob_ref[0])                                          # (TB, D)

    # ---- FC on concat([local, global]) as a split matmul (no lane concat) -
    wfc = wfc_ref[...].astype(jnp.float32)               # (2D, O_pad)
    out = (jnp.dot(local_fea, wfc[:D], preferred_element_type=jnp.float32)
           + jnp.dot(global_fea, wfc[D:], preferred_element_type=jnp.float32)
           + bfc_ref[...].astype(jnp.float32))           # (TB, O_pad)
    out_ref[...] = out.astype(out_ref.dtype)


def _pick_tb(B, L, D, tile_budget_bytes):
    # Biggest batch tile whose (TB, L, D) f32 x-block fits the per-buffer budget.
    tb = max(1, tile_budget_bytes // (L * D * 4))
    tb = min(tb, B)
    if tb < B:
        # blocks that don't span the full batch need sublane-aligned rows
        tb = max(8, (tb // 8) * 8)
    return tb


def dattn_net(x, wloc, bloc, wglob, bglob, wfc, bfc, *,
              tile_budget_bytes=4 * 1024 * 1024):
    """Forward pass of DAttn2.Net (eval mode).

    tile_budget_bytes sizes the per-buffer x tile; the pipeline double-buffers
    it, so keep 2*budget (+ weights) well under the scoped VMEM limit
    (32 MiB default). Halve the budget when targeting v7x (64 MiB VMEM total),
    and keep multiple grid steps so the parallel axis shards over its 2 TCs.
    """
    B, L, D = x.shape
    win = wloc.shape[0]
    O = wfc.shape[1]
    assert win % 2 == 1, "even ctx_win_size changes conv output length (L-1); unsupported"
    assert wfc.shape[0] == 2 * D

    TB = _pick_tb(B, L, D, tile_budget_bytes)
    nb = pl.cdiv(B, TB)
    Bp = nb * TB
    if Bp != B:
        x = jnp.pad(x, ((0, Bp - B), (0, 0), (0, 0)))

    # lane-dense output: pad the tiny O axis up to a multiple of 128 lanes
    O_pad = pl.cdiv(O, 128) * 128
    wfc_p = jnp.pad(wfc, ((0, 0), (0, O_pad - O))) if O_pad != O else wfc
    bfc_p = jnp.pad(bfc, ((0, 0), (0, O_pad - O))) if O_pad != O else bfc

    wlocT = jnp.transpose(wloc)                            # (D, win)
    bloc_s = jnp.reshape(bloc, (1,)).astype(jnp.float32)   # scalar conv biases -> SMEM
    bglob_s = jnp.reshape(bglob, (1,)).astype(jnp.float32)

    out = pl.pallas_call(
        dattn_kernel,
        out_shape=jax.ShapeDtypeStruct((Bp, O_pad), jnp.float32),
        grid_spec=pltpu.PrefetchScalarGridSpec(
            num_scalar_prefetch=0,
            grid=(nb,),
            in_specs=[
                pl.BlockSpec((TB, L, D), lambda b: (b, 0, 0)),       # x tile
                pl.BlockSpec((D, win), lambda b: (0, 0)),            # local conv weight^T
                pl.BlockSpec((1, L), lambda b: (0, 0)),              # global conv weight
                pl.BlockSpec((2 * D, O_pad), lambda b: (0, 0)),      # fc weight (transposed)
                pl.BlockSpec((1, O_pad), lambda b: (0, 0)),          # fc bias
                pl.BlockSpec(memory_space=pltpu.MemorySpace.SMEM),   # local conv bias (scalar)
                pl.BlockSpec(memory_space=pltpu.MemorySpace.SMEM),   # global conv bias (scalar)
            ],
            out_specs=pl.BlockSpec((TB, O_pad), lambda b: (b, 0)),
        ),
        compiler_params=pltpu.CompilerParams(
            dimension_semantics=("parallel",)),
    )(x, wlocT, wglob, wfc_p, bfc_p, bloc_s, bglob_s)

    return out[:B, :O]


def ref_forward(x, wloc, bloc, wglob, bglob, wfc, bfc):
    # pure-JAX reference for validation
    B, L, D = x.shape
    win = wloc.shape[0]
    pad = (win - 1) // 2
    xp = jnp.pad(x, ((0, 0), (pad, pad), (0, 0)))
    scores = jnp.zeros((B, L), jnp.float32)
    for dw in range(win):
        scores = scores + jnp.einsum('bld,d->bl', xp[:, dw:dw + L, :], wloc[dw])
    scores = scores + bloc[0, 0]
    p = jax.nn.softmax(scores, axis=1)
    local = jnp.einsum('bl,bld->bd', p, x)
    glob = jnp.einsum('l,bld->bd', wglob[0], x) + bglob[0, 0]
    cat = jnp.concatenate([local, glob], axis=1)
    return cat @ wfc + bfc


if __name__ == "__main__":
    # small shapes implied by the module:
    #   bsz=2, max_doc_len=8, word_embed_dim=32, ctx_win_size=3, output_size=8
    B, L, D, win, O = 2, 8, 32, 3, 8

    key = jax.random.PRNGKey(0)
    kx, k1, k2, k3, k4, k5, k6 = jax.random.split(key, 7)

    x = jax.random.normal(kx, (B, L, D), jnp.float32)

    # deterministic parameter init mirroring reset_para():
    # xavier_uniform for conv weights, uniform(-0.1, 0.1) for conv biases / fc weight
    bound_loc = (6.0 / (win * D + win * D)) ** 0.5
    wloc = jax.random.uniform(k1, (win, D), jnp.float32, -bound_loc, bound_loc)
    bloc = jax.random.uniform(k2, (1, 1), jnp.float32, -0.1, 0.1)
    bound_g = (6.0 / (L + L)) ** 0.5
    wglob = jax.random.uniform(k3, (1, L), jnp.float32, -bound_g, bound_g)
    bglob = jax.random.uniform(k4, (1, 1), jnp.float32, -0.1, 0.1)
    wfc = jax.random.uniform(k5, (2 * D, O), jnp.float32, -0.1, 0.1)   # Linear weight (transposed)
    bb = 1.0 / (2 * D) ** 0.5
    bfc = jax.random.uniform(k6, (1, O), jnp.float32, -bb, bb)         # Linear default bias init

    out = dattn_net(x, wloc, bloc, wglob, bglob, wfc, bfc)
    out = jax.block_until_ready(out)

    ref = ref_forward(x, wloc, bloc, wglob, bglob, wfc, bfc)
    assert out.shape == (B, O)
    assert jnp.allclose(out, ref, atol=1e-4, rtol=1e-4), (out, ref)

    print("KERNEL_OK")
</pallas_src>

<mosaic_0001>
module attributes {stable_mosaic.version = 11 : i64} {
  func.func @dattn_kernel(%arg0: i32, %arg1: memref<2x8x32xf32, #tpu.memory_space<vmem>>, %arg2: memref<32x3xf32, #tpu.memory_space<vmem>>, %arg3: memref<1x8xf32, #tpu.memory_space<vmem>>, %arg4: memref<64x128xf32, #tpu.memory_space<vmem>>, %arg5: memref<1x128xf32, #tpu.memory_space<vmem>>, %arg6: memref<1xf32, #tpu.memory_space<smem>>, %arg7: memref<1xf32, #tpu.memory_space<smem>>, %arg8: memref<2x128xf32, #tpu.memory_space<vmem>>) attributes {dimension_semantics = [#tpu.dimension_semantics<parallel>], iteration_bounds = array<i64: 1>, scalar_prefetch = 0 : i64, scratch_operands = 0 : i64, tpu.core_type = #tpu.core_type<tc>, window_params = [{transform_indices = @transform_0, window_bounds = array<i64: 2, 8, 32>}, {pipeline_mode = #tpu.pipeline_mode<synchronous>, transform_indices = @transform_1, window_bounds = array<i64: 32, 3>}, {pipeline_mode = #tpu.pipeline_mode<synchronous>, transform_indices = @transform_2, window_bounds = array<i64: 1, 8>}, {pipeline_mode = #tpu.pipeline_mode<synchronous>, transform_indices = @transform_3, window_bounds = array<i64: 64, 128>}, {pipeline_mode = #tpu.pipeline_mode<synchronous>, transform_indices = @transform_4, window_bounds = array<i64: 1, 128>}, {transform_indices = @transform_5, window_bounds = array<i64: 1>}, {transform_indices = @transform_6, window_bounds = array<i64: 1>}, {transform_indices = @transform_7, window_bounds = array<i64: 2, 128>}]} {
    %c0 = arith.constant 0 : index
    %c0_0 = arith.constant 0 : index
    %c0_1 = arith.constant 0 : index
    %0 = vector.load %arg1[%c0, %c0_0, %c0_1] : memref<2x8x32xf32, #tpu.memory_space<vmem>>, vector<2x8x32xf32>
    %1 = vector.shape_cast %0 : vector<2x8x32xf32> to vector<16x32xf32>
    %c0_2 = arith.constant 0 : index
    %c0_3 = arith.constant 0 : index
    %2 = vector.load %arg2[%c0_2, %c0_3] : memref<32x3xf32, #tpu.memory_space<vmem>>, vector<32x3xf32>
    %cst = arith.constant dense<0.000000e+00> : vector<16x3xf32>
    %3 = tpu.matmul %1, %2, %cst {dimension_numbers = #tpu.dot_dimension_numbers<[1], [0], [0], [1], [0, 0, 1, 1], [], []>} : vector<16x32xf32>, vector<32x3xf32>, vector<16x3xf32> -> vector<16x3xf32>
    %4 = vector.shape_cast %3 : vector<16x3xf32> to vector<2x8x3xf32>
    %cst_4 = arith.constant 0.000000e+00 : f32
    %5 = vector.broadcast %cst_4 : f32 to vector<2x8xf32>
    %c0_5 = arith.constant 0 : index
    %6 = memref.load %arg6[%c0_5] : memref<1xf32, #tpu.memory_space<smem>>
    %7 = vector.broadcast %6 : f32 to vector<2x8xf32>
    %8 = arith.addf %5, %7 : vector<2x8xf32>
    %9 = vector.extract_strided_slice %4 {offsets = [0, 0, 0], sizes = [2, 8, 1], strides = [1, 1, 1]} : vector<2x8x3xf32> to vector<2x8x1xf32>
    %10 = vector.shape_cast %9 : vector<2x8x1xf32> to vector<2x8xf32>
    %cst_6 = arith.constant 0.000000e+00 : f32
    %11 = vector.broadcast %cst_6 : f32 to vector<2x1xf32>
    %12 = vector.extract_strided_slice %10 {offsets = [0, 0], sizes = [2, 7], strides = [1, 1]} : vector<2x8xf32> to vector<2x7xf32>
    %13 = tpu.concatenate %11, %12 in 1 : vector<2x1xf32>, vector<2x7xf32> -> vector<2x8xf32>
    %14 = arith.addf %8, %13 : vector<2x8xf32>
    %15 = vector.extract_strided_slice %4 {offsets = [0, 0, 1], sizes = [2, 8, 1], strides = [1, 1, 1]} : vector<2x8x3xf32> to vector<2x8x1xf32>
    %16 = vector.shape_cast %15 : vector<2x8x1xf32> to vector<2x8xf32>
    %17 = arith.addf %14, %16 : vector<2x8xf32>
    %18 = vector.extract_strided_slice %4 {offsets = [0, 0, 2], sizes = [2, 8, 1], strides = [1, 1, 1]} : vector<2x8x3xf32> to vector<2x8x1xf32>
    %19 = vector.shape_cast %18 : vector<2x8x1xf32> to vector<2x8xf32>
    %20 = vector.extract_strided_slice %19 {offsets = [0, 1], sizes = [2, 7], strides = [1, 1]} : vector<2x8xf32> to vector<2x7xf32>
    %cst_7 = arith.constant 0.000000e+00 : f32
    %21 = vector.broadcast %cst_7 : f32 to vector<2x1xf32>
    %22 = tpu.concatenate %20, %21 in 1 : vector<2x7xf32>, vector<2x1xf32> -> vector<2x8xf32>
    %23 = arith.addf %17, %22 : vector<2x8xf32>
    %cst_8 = arith.constant dense<0xFF800000> : vector<2xf32>
    %24 = vector.multi_reduction <maximumf>, %23, %cst_8 [1] : vector<2x8xf32> to vector<2xf32>
    %25 = vector.shape_cast %24 : vector<2xf32> to vector<2x1xf32>
    %26 = vector.broadcast %25 : vector<2x1xf32> to vector<2x8xf32>
    %27 = arith.subf %23, %26 : vector<2x8xf32>
    %28 = math.exp %27 : vector<2x8xf32>
    %cst_9 = arith.constant dense<0.000000e+00> : vector<2xf32>
    %29 = vector.multi_reduction <add>, %28, %cst_9 [1] : vector<2x8xf32> to vector<2xf32>
    %30 = vector.shape_cast %29 : vector<2xf32> to vector<2x1xf32>
    %31 = vector.broadcast %30 : vector<2x1xf32> to vector<2x8xf32>
    %32 = arith.divf %28, %31 : vector<2x8xf32>
    %33 = vector.shape_cast %32 : vector<2x8xf32> to vector<2x1x8xf32>
    "tpu.trace_start"() <{level = 10 : i32, message = "bkl,bld->bkd"}> : () -> ()
    %cst_10 = arith.constant dense<0.000000e+00> : vector<2x1x32xf32>
    %34 = tpu.matmul %33, %0, %cst_10 {dimension_numbers = #tpu.dot_dimension_numbers<[2], [1], [1], [2], [0, 0, 0, 1, 1, 2], [0], [0]>} : vector<2x1x8xf32>, vector<2x8x32xf32>, vector<2x1x32xf32> -> vector<2x1x32xf32>
    "tpu.trace_stop"() : () -> ()
    %35 = vector.shape_cast %34 : vector<2x1x32xf32> to vector<2x32xf32>
    %c0_11 = arith.constant 0 : index
    %c0_12 = arith.constant 0 : index
    %36 = vector.load %arg3[%c0_11, %c0_12] : memref<1x8xf32, #tpu.memory_space<vmem>>, vector<1x8xf32>
    %37 = vector.shape_cast %36 : vector<1x8xf32> to vector<1x1x8xf32>
    %38 = vector.shape_cast %37 : vector<1x1x8xf32> to vector<1x1x8xf32>
    %39 = vector.broadcast %38 : vector<1x1x8xf32> to vector<2x1x8xf32>
    "tpu.trace_start"() <{level = 10 : i32, message = "bkl,bld->bkd"}> : () -> ()
    %cst_13 = arith.constant dense<0.000000e+00> : vector<2x1x32xf32>
    %40 = tpu.matmul %39, %0, %cst_13 {dimension_numbers = #tpu.dot_dimension_numbers<[2], [1], [1], [2], [0, 0, 0, 1, 1, 2], [0], [0]>} : vector<2x1x8xf32>, vector<2x8x32xf32>, vector<2x1x32xf32> -> vector<2x1x32xf32>
    "tpu.trace_stop"() : () -> ()
    %41 = vector.shape_cast %40 : vector<2x1x32xf32> to vector<2x32xf32>
    %c0_14 = arith.constant 0 : index
    %42 = memref.load %arg7[%c0_14] : memref<1xf32, #tpu.memory_space<smem>>
    %43 = vector.broadcast %42 : f32 to vector<2x32xf32>
    %44 = arith.addf %41, %43 : vector<2x32xf32>
    %c0_15 = arith.constant 0 : index
    %c0_16 = arith.constant 0 : index
    %45 = vector.load %arg4[%c0_15, %c0_16] : memref<64x128xf32, #tpu.memory_space<vmem>>, vector<64x128xf32>
    %46 = vector.extract_strided_slice %45 {offsets = [0, 0], sizes = [32, 128], strides = [1, 1]} : vector<64x128xf32> to vector<32x128xf32>
    %cst_17 = arith.constant dense<0.000000e+00> : vector<2x128xf32>
    %47 = tpu.matmul %35, %46, %cst_17 {dimension_numbers = #tpu.dot_dimension_numbers<[1], [0], [0], [1], [0, 0, 1, 1], [], []>} : vector<2x32xf32>, vector<32x128xf32>, vector<2x128xf32> -> vector<2x128xf32>
    %48 = vector.extract_strided_slice %45 {offsets = [32, 0], sizes = [32, 128], strides = [1, 1]} : vector<64x128xf32> to vector<32x128xf32>
    %cst_18 = arith.constant dense<0.000000e+00> : vector<2x128xf32>
    %49 = tpu.matmul %44, %48, %cst_18 {dimension_numbers = #tpu.dot_dimension_numbers<[1], [0], [0], [1], [0, 0, 1, 1], [], []>} : vector<2x32xf32>, vector<32x128xf32>, vector<2x128xf32> -> vector<2x128xf32>
    %50 = arith.addf %47, %49 : vector<2x128xf32>
    %c0_19 = arith.constant 0 : index
    %c0_20 = arith.constant 0 : index
    %51 = vector.load %arg5[%c0_19, %c0_20] : memref<1x128xf32, #tpu.memory_space<vmem>>, vector<1x128xf32>
    %52 = vector.broadcast %51 : vector<1x128xf32> to vector<2x128xf32>
    %53 = arith.addf %50, %52 : vector<2x128xf32>
    %c0_21 = arith.constant 0 : index
    %c0_22 = arith.constant 0 : index
    %54 = vector.load %arg8[%c0_21, %c0_22] : memref<2x128xf32, #tpu.memory_space<vmem>>, vector<2x128xf32>
    tpu.vector_store %arg8[%c0_21, %c0_22], %53 {strides = array<i32>} : memref<2x128xf32, #tpu.memory_space<vmem>>, vector<2x128xf32>,
    return
  }
  func.func @transform_0(%arg0: i32) -> (i32, i32, i32) {
    %c0_i32 = arith.constant 0 : i32
    %c0_i32_0 = arith.constant 0 : i32
    %c0_i32_1 = arith.constant 0 : i32
    return %arg0, %c0_i32, %c0_i32_0 : i32, i32, i32
  }
  func.func @transform_1(%arg0: i32) -> (i32, i32) {
    %c0_i32 = arith.constant 0 : i32
    %c0_i32_0 = arith.constant 0 : i32
    %c0_i32_1 = arith.constant 0 : i32
    return %c0_i32, %c0_i32_0 : i32, i32
  }
  func.func @transform_2(%arg0: i32) -> (i32, i32) {
    %c0_i32 = arith.constant 0 : i32
    %c0_i32_0 = arith.constant 0 : i32
    %c0_i32_1 = arith.constant 0 : i32
    return %c0_i32, %c0_i32_0 : i32, i32
  }
  func.func @transform_3(%arg0: i32) -> (i32, i32) {
    %c0_i32 = arith.constant 0 : i32
    %c0_i32_0 = arith.constant 0 : i32
    %c0_i32_1 = arith.constant 0 : i32
    return %c0_i32, %c0_i32_0 : i32, i32
  }
  func.func @transform_4(%arg0: i32) -> (i32, i32) {
    %c0_i32 = arith.constant 0 : i32
    %c0_i32_0 = arith.constant 0 : i32
    %c0_i32_1 = arith.constant 0 : i32
    return %c0_i32, %c0_i32_0 : i32, i32
  }
  func.func @transform_5(%arg0: i32) -> i32 {
    %c0_i32 = arith.constant 0 : i32
    %c0_i32_0 = arith.constant 0 : i32
    return %c0_i32 : i32
  }
  func.func @transform_6(%arg0: i32) -> i32 {
    %c0_i32 = arith.constant 0 : i32
    %c0_i32_0 = arith.constant 0 : i32
    return %c0_i32 : i32
  }
  func.func @transform_7(%arg0: i32) -> (i32, i32) {
    %c0_i32 = arith.constant 0 : i32
    %c0_i32_0 = arith.constant 0 : i32
    return %arg0, %c0_i32 : i32, i32
  }
}

</mosaic_0001>

<bundles_post_ra>
// kernel: tpu_custom_call.1
= control target key start
LH: loop header
LB: loop body
LE: loop exit
PB: predicated region body
PF: predicated region fallthrough
CT: control target
= control target key end

     0   :  { %14 = vsyncpa [#allocation5], 0  ;;  %s1019_s0 = inlined_call_operand.vmem [shape: f32[2,8,32], index: 0, kind: input, shape index: {}]   ;;  %s1020_s1 = inlined_call_operand.vmem [shape: f32[32,3], index: 1, kind: input, shape index: {}]   ;;  %s1021_s2 = inlined_call_operand.vmem [shape: f32[1,8], index: 2, kind: input, shape index: {}]   ;;  %s1022_s3 = inlined_call_operand.hbm [shape: f32[64,128], index: 3, kind: input, shape index: {}]   ;;  %s1023_s4 = inlined_call_operand.vmem [shape: f32[1,128], index: 4, kind: input, shape index: {}]   ;;  %s1024_s5 = inlined_call_operand.<no memory space> [shape: f32[1], index: 5, kind: input, shape index: {}]   ;;  %s1025_s6 = inlined_call_operand.<no memory space> [shape: f32[1], index: 6, kind: input, shape index: {}]   ;;  %s1026_s7 = inlined_call_operand.hbm [shape: f32[2,128], index: 7, kind: output, shape index: {}]  }
   0x1   :  { %15 = vsyncpa [#allocation6], 0  ;;  %s886_s24 = smov [#allocation4]   ;;  %s838_s28 = scalar_lea.hbm %s1022_s3, 1024 }
   0x2   :  { %s27_s25 = sshll.u32 %s886_s24, 4  ;;  %p839_p0 = scmp.ne.s32.totalorder %s1022_s3, %s838_s28  ;;  %s28_s25 = int_to_ptr.vmem [resolvable:$true] %s27_s25 }
   0x3   :  { %p842_p1 = scmp.lt.u32.totalorder %s838_s28, %s1022_s3 }
   0x5   :  { %p844_p2 = pnand %p842_p1, %p839_p0 }
   0x7   :  { %847 = shalt.err (!%p844_p2)
}
   0x8   :  { %s848_s10 = scalar_lea.vmem %s28_s25, 1024  ;;  %p853_p4 = scmp.lt.s32.totalorder %s28_s25, %s28_s25 }
   0x9   :  { %p849_p3 = scmp.ne.s32.totalorder %s28_s25, %s848_s10  ;;  %p854_p5 = scmp.lt.s32.totalorder %s848_s10, %s848_s10 }
   0xb   :  { %p855_p6 = por %p854_p5, %p853_p4 }
   0xd   :  { %p856_p7 = pnand %p855_p6, %p849_p3 }
   0xf   :  { %859 = shalt.err (!%p856_p7)
}
  0x10   :  { %s887_s11 = smov 128   ;;  %s888_s12 = smov 8  }
  0x11   :  { %33 = dma.hbm_to_vmem [thread:$0]  %s1022_s3, 1024, %s28_s25, [#allocation5], %s887_s11, %s887_s11, %s888_s12  }
  0x12   :  { %882 = dma.done.wait [#allocation5], 1024  }
  0x13   :  { %883 = vsyncadd [#allocation5], 4294966272  ;;  %v889_v0 = vmov 2   ;;  %v890_v1 = vmov 0   ;;  %vm49_vm0 = vcmask 261120   ;;  %v45_v2 = vld [vmem:[%s1020_s1] sm:$0xff]  ;;  %v142_v13 = vlaneseq }
  0x14   :  { %830 = vset.pattern.permute.xlu1 %v889_v0  ;;  %829 = vset.pattern.permute.xlu0 %v890_v1  ;;  %v46_v3 = vld [vmem:[%s1020_s1 + $0x8] sm:$0xff]  ;;  %v47_v4 = vld [vmem:[%s1020_s1 + $0x10] sm:$0xff]  ;;  %v48_v6 = vld [vmem:[%s1020_s1 + $0x18] sm:$0xff]  ;;  %v891_v12 = vmov 1   ;;  %vm191_vm1 = vcmask 1042434   ;;  %vm153_vm2 = vcmask 1041409   ;;  %v132_v32 = vstv %s1024_s5 }
  0x15   :  { %v798_v5 = vpack.c.bf16 %v46_v3, %v45_v2  ;;  %v964_v7 = vld [vmem:[%s1019_s0] sm:$0xff]  ;;  %v802_v8 = vpack.c.bf16 %v48_v6, %v47_v4  ;;  %v971_v9 = vld [vmem:[%s1019_s0 + $0x8] sm:$0xff]  ;;  %v143_v14 = vand.u32 127, %v142_v13  ;;  %v146_v15 = vshrl.u32 %v142_v13, 7  ;;  %v530_v4 = vld [vmem:[#allocation4 + $0x10] sm:$0xff]  ;;  %s896_s29 = smov [#allocation7]  }
  0x16   :  { %753 = vmatprep.mubr.msk.f32.mxu0 %vm49_vm0, %v964_v7  ;;  %vm156_vm3 = vcmask 7168   ;;  %vm194_vm4 = vcmask 56320   ;;  %vm200_vm5 = vcmask 58368   ;;  %v892_v49 = vmov 0.0   ;;  %v380_v50 = vld [vmem:[%s1021_s2] sm:$0x1] }
  0x17   :  { %799 = vmatprep.subr.bf16.mxu0 %v798_v5  ;;  %v182_v16 = vadd.s32 1, %v143_v14  ;;  %v144_v17 = vadd.s32 4294967295, %v143_v14  ;;  %v167_v28 = vsub.s32 %v143_v14, %v146_v15  ;;  %756 = vmatprep.subr.mxu1 %v892_v49  ;;  %vm893_vm6 = vmmov 0   ;;  %v528_v62 = vld [vmem:[#allocation4] sm:$0xff]  ;;  %v529_v63 = vld [vmem:[#allocation4 + $0x8] sm:$0xff]  ;;  %v531_v6 = vld [vmem:[#allocation4 + $0x18] sm:$0xff] }
  0x18   :  { %801 = vmatpush3.bf16.msra.mxu0 %v798_v5  ;;  %758 = vmatprep.mubr.msk.f32.mxu1 %vm893_vm6, %v892_v49  ;;  %vm235_vm7 = vcmask 64512   ;;  %v894_v52 = vmov 1966171168   ;;  %v895_v1 = vmov 0.0|0.0   ;;  %v532_v2 = vld [vmem:[#allocation4 + $0x20] sm:$0xff]  ;;  %v533_v3 = vld [vmem:[#allocation4 + $0x28] sm:$0xff]  ;;  %v525_v14 = vstv %s1025_s6 }
  0x19   :  { %803 = vmatprep.subr.bf16.mxu0 %v802_v8  ;;  %v185_v20 = vsub.s32 %v182_v16, %v146_v15  ;;  %v147_v21 = vsub.s32 %v144_v17, %v146_v15  ;;  %757 = vmatpush3.msra.mxu1 %v964_v7  ;;  %v214_v53 = vunpack.c.l.s4 %v894_v52  ;;  %v807_v5 = vpack.c.bf16 %v533_v3, %v532_v2  ;;  %s703_s30 = sshll.u32 %s896_s29, 4  ;;  %s704_s30 = int_to_ptr.vmem [resolvable:$true] %s703_s30 }
  0x1a   :  { %761 = vmatprep.subr.mxu1 %v892_v49  ;;  %s860_s8 = scalar_lea.vmem %s704_s30, 32  ;;  %p865_p9 = scmp.lt.s32.totalorder %s704_s30, %s704_s30 }
  0x1b   :  { %v215_v54 = vunpack.c.0.s8 %v214_v53  ;;  %p861_p8 = scmp.ne.s32.totalorder %s704_s30, %s860_s8  ;;  %p866_p10 = scmp.lt.s32.totalorder %s860_s8, %s860_s8 }
  0x1c   :  { %805 = vmatpush3.bf16.msra.mxu0 %v802_v8 }
  0x1d   :  { %771 = vmatprep.subr.mxu0 %v892_v49  ;;  %v218_v55 = vsub.s32 %v215_v54, %v146_v15  ;;  %p867_p11 = por %p866_p10, %p865_p9 }
  0x1f   :  { %754 = vmatmul.mubr.msk.f32.vlgmr.msra.gmra.mrb[0].mxu0 %vm49_vm0, %v971_v9  ;;  %p868_p12 = pnand %p867_p11, %p861_p8 }
  0x20   :  { %772 = vmatpush3.msra.mxu0 %v971_v9  ;;  %773 = vmatprep.mubr.msk.f32.mxu0 %vm893_vm6, %v892_v49 }
  0x21   :  { %812 = vmatprep.subr.bf16.mxu0 %v895_v1 }
  0x23   :  { %774 = vmatmul.mubr.msk.f32.vlgmr.msra.gmra.mrb[2].mxu0 %vm235_vm7, %v380_v50 }
  0x24   :  { %795 = vmatprep.mubr.msk.f32.mxu0 %vm893_vm6, %v892_v49 }
  0xf2   :  { %v755_v10 = vpop.f32.mrb[0].mxu0 }
  0xf3   :  { %180 = vperm.xlu1 %830, %v755_v10   ;;  %140 = vperm.xlu0 %829, %v755_v10   ;;  %v122_v11 = vpop.f32.mrb[1].mxu0 }
  0xf6   :  { %v520_v8 = vpop.f32.mrb[2].mxu0 }
  0xf7   :  { %177 = vperm.xlu1 %830, %v122_v11   ;;  %137 = vperm.xlu0 %829, %v122_v11   ;;  %v527_v16 = vadd.f32 %v525_v14, %v520_v8 }
  0xfb   :  { %832 = vset.pattern.permute.xlu1 %v891_v12  ;;  %831 = vset.pattern.permute.xlu0 %v891_v12 }
  0xfc   :  { %163 = vperm.xlu1 %832, %v755_v10   ;;  %160 = vperm.xlu0 %831, %v122_v11   ;;  %v534_v10 = vld [vmem:[#allocation4 + $0x30] sm:$0xff]  ;;  %v535_v11 = vld [vmem:[#allocation4 + $0x38] sm:$0xff] }
  0xfd   :  { %v810_v12 = vpack.c.bf16 %v535_v11, %v534_v10 }
 0x100   :  { %833 = vset.pattern.permute.xlu0 %v889_v0  ;;  %v813_v0 = vpack.c.bf16 %v529_v63, %v528_v62 }
 0x102   :  { %814 = vmatpush3.bf16.msra.mxu0 %v813_v0 }
 0x103   :  { %815 = vmatprep.subr.bf16.mxu0 %v895_v1 }
 0x172   :  { %v181_v18 = vpop.permute.xlu1 %180  ;;  %v141_v19 = vpop.permute.xlu0 %140 }
 0x173   :  { %v190_v24 = vrot.slane %v181_v18, %v185_v20  ;;  %v152_v25 = vrot.slane %v141_v19, %v147_v21 }
 0x176   :  { %v178_v22 = vpop.permute.xlu1 %177  ;;  %v138_v23 = vpop.permute.xlu0 %137 }
 0x177   :  { %v186_v26 = vrot.slane %v178_v22, %v185_v20  ;;  %v148_v27 = vrot.slane %v138_v23, %v147_v21  ;;  %v538_v21 = vrot.slane %v527_v16, 7 }
 0x179   :  { %v192_v29 = vsel %vm191_vm1, %v190_v24, %v186_v26  ;;  %v154_v30 = vsel %vm153_vm2, %v152_v25, %v148_v27 }
 0x17a   :  { %v157_v31 = vsel %vm156_vm3, 0.0, %v154_v30  ;;  %v195_v37 = vsel %vm194_vm4, %v192_v29, 0.0  ;;  %v720_v29 = vld [vmem:[%s1023_s4] ss:$0 sm:$0xff] }
 0x17b   :  { %v164_v33 = vpop.permute.xlu1 %163  ;;  %v161_v34 = vpop.permute.xlu0 %160  ;;  %v158_v38 = vadd.f32 %v157_v31, %v132_v32  ;;  %v197_v41 = vrot.slane %v195_v37, 1 }
 0x17c   :  { %v172_v35 = vrot.slane %v164_v33, %v167_v28  ;;  %v168_v36 = vrot.slane %v161_v34, %v167_v28 }
 0x17e   :  { %v173_v39 = vsel %vm153_vm2, %v172_v35, %v168_v36 }
 0x17f   :  { %v175_v40 = vadd.f32 %v173_v39, %v158_v38 }
 0x181   :  { %v199_v42 = vadd.f32 %v197_v41, %v175_v40 }
 0x183   :  { %v201_v43 = vsel %vm200_vm5, %v199_v42, -inf }
 0x184   :  { %202 = vmax.xlane.f32.xlu1 %v201_v43 }
 0x211   :  { %v203_v44 = vpop.xlane.xlu1 %202 }
 0x212   :  { %v204_v45 = vsub.f32 %v199_v42, %v203_v44 }
 0x214   :  { %v205_v46 = vmul.f32 1.442695, %v204_v45 }
 0x216   :  { %834 = vpow2.f32 %v205_v46 }
 0x220   :  { %v835_v47 = vpop.eup %834 }
 0x221   :  { %v207_v48 = vsel %vm200_vm5, %v835_v47, 0.0 }
 0x222   :  { %208 = vadd.xlane.f32.xlu0 %v207_v48 }
 0x2af   :  { %v209_v51 = vpop.xlane.xlu0 %208 }
 0x2b0   :  { %836 = vrcp.f32 %v209_v51 }
 0x2ba   :  { %v837_v56 = vpop.eup %836 }
 0x2bb   :  { %v211_v57 = vmul.f32 %v837_v56, %v835_v47 }
 0x2bd   :  { %v219_v58 = vrot.slane %v211_v57, %v218_v55 }
 0x2bf   :  { %v220_v59 = vcombine.high %v219_v58, %v219_v58  ;;  %v227_v60 = vrot.slane %v219_v58, %v218_v55 }
 0x2c1   :  { %759 = vmatmul.mubr.msk.f32.vlgmr.msra.gmra.mrb[0].mxu1 %vm235_vm7, %v227_v60  ;;  %v234_v61 = vrot.slane %v220_v59, %v218_v55 }
 0x2c2   :  { %762 = vmatpush3.msra.mxu1 %v971_v9  ;;  %763 = vmatprep.mubr.msk.f32.mxu1 %vm893_vm6, %v892_v49  ;;  %v775_v9 = vpop.f32.mrb[3].mxu0 }
 0x2c3   :  { %766 = vmatprep.subr.mxu1 %v892_v49 }
 0x2c5   :  { %764 = vmatmul.mubr.msk.f32.vlgmr.msra.gmra.mrb[2].mxu1 %vm235_vm7, %v234_v61 }
 0x2c6   :  { %767 = vmatpush3.msra.mxu1 %v964_v7  ;;  %768 = vmatprep.mubr.msk.f32.mxu1 %vm893_vm6, %v892_v49  ;;  %v816_v7 = vpack.c.bf16 %v531_v6, %v530_v4 }
 0x2c7   :  { %806 = vmatprep.subr.bf16.mxu1 %v895_v1 }
 0x2c8   :  { %817 = vmatpush3.bf16.msra.mxu0 %v816_v7 }
 0x2c9   :  { %769 = vmatmul.mubr.msk.f32.vlgmr.msra.gmra.mrb[4].mxu1 %vm235_vm7, %v380_v50 }
 0x2ca   :  { %784 = vmatprep.mubr.msk.f32.mxu1 %vm893_vm6, %v892_v49  ;;  %808 = vmatpush3.bf16.msra.mxu1 %v807_v5 }
 0x2cb   :  { %809 = vmatprep.subr.bf16.mxu1 %v895_v1 }
 0x2ce   :  { %811 = vmatpush3.bf16.msra.mxu1 %v810_v12 }
 0x394   :  { %v304_v13 = vpop.f32.mrb[0].mxu1 }
 0x395   :  { %v760_v15 = vpop.f32.mrb[1].mxu1 }
 0x398   :  { %v376_v17 = vpop.f32.mrb[2].mxu1 }
 0x399   :  { %v614_v18 = vrot.slane %v376_v17, 7  ;;  %v765_v19 = vpop.f32.mrb[3].mxu1 }
 0x39b   :  { %v615_v20 = vsel %vm153_vm2, %v614_v18, %v304_v13 }
 0x39c   :  { %v450_v22 = vpop.f32.mrb[4].mxu1  ;;  %796 = vmatmul.mubr.msk.f32.vlgmr.msra.gmra.mrb[4].mxu0 %vm49_vm0, %v615_v20 }
 0x39d   :  { %v526_v23 = vadd.f32 %v525_v14, %v450_v22  ;;  %v770_v24 = vpop.f32.mrb[5].mxu1 }
 0x39f   :  { %v539_v25 = vsel %vm153_vm2, %v538_v21, %v526_v23 }
 0x3a0   :  { %785 = vmatmul.mubr.msk.f32.vlgmr.msra.gmra.mrb[6].mxu1 %vm49_vm0, %v539_v25 }
 0x46f   :  { %v684_v26 = vpop.f32.mrb[4].mxu0 }
 0x470   :  { %v797_v27 = vpop.f32.mrb[5].mxu0 }
 0x473   :  { %v608_v28 = vpop.f32.mrb[6].mxu1 }
 0x474   :  { %v685_v30 = vadd.f32 %v684_v26, %v608_v28  ;;  %v786_v31 = vpop.f32.mrb[7].mxu1 }
 0x476   :  { %v695_v32 = vadd.f32 %v720_v29, %v685_v30 }
 0x478   :  { %696 = vst [vmem:[#allocation7] sm:$0x3] %v695_v32 }
 0x479   :  { %871 = shalt.err (!%p868_p12)
}
 0x47a   :  { %s872_s11 = scalar_lea.hbm %s1026_s7, 32 }
 0x47b   :  { %p873_p13 = scmp.ne.s32.totalorder %s1026_s7, %s872_s11  ;;  %p876_p0 = scmp.lt.u32.totalorder %s872_s11, %s1026_s7 }
 0x47d   :  { %p878_p1 = pnand %p876_p0, %p873_p13 }
 0x47f   :  { %881 = shalt.err (!%p878_p1)
}
 0x480   :  { %706 = dma.vmem_to_hbm [thread:$0]  %s704_s30, 32, %s1026_s7, [#allocation6]  }
 0x481   :  { %884 = dma.done.wait [#allocation6], 32  }
 0x482   :  { %885 = vsyncadd [#allocation6], 4294967264 }
 0x483   :  { %710 = vsyncpa [#allocation5], 1 }
 0x484   :  { %711 = vsyncpa [#allocation6], 1 }

</bundles_post_ra>
